<compile_context>
chip_gen: v5e
topology: v5e:2x2
jax: 0.10.0
libtpu: 0.0.40
codegen_flags: <defaults>
</compile_context>

<pallas_src>
import functools

import jax
import jax.numpy as jnp
from jax import lax
from jax.experimental import pallas as pl
from jax.experimental.pallas import tpu as pltpu


def _round_up(x, m):
    return ((x + m - 1) // m) * m


def _focal_weight(one_minus_pt, gamma):
    """(1 - pt) ** gamma, with small integer gamma unrolled as multiplies (no exp/log)."""
    g = float(gamma)
    if g == 0.0:
        return jnp.ones_like(one_minus_pt)
    if g == int(g) and 0 < int(g) <= 8:
        w = one_minus_pt
        for _ in range(int(g) - 1):
            w = w * one_minus_pt
        return w
    return one_minus_pt ** g  # non-integer gamma: exp/log path on the EUP


def _cls_mdca_kernel(tgt_ref, x_ref, cls_ref, conf_ref, *,
                     mode, gamma, alpha, n_cols, block_cols, needs_mask):
    """One batch tile, transposed layout: classes on sublanes, batch on lanes.

    Writes per-block partials: scalar classification-loss sum and a (C,) column of
    per-class softmax-probability sums.  The target histogram lives in the wrapper."""

    def body(valid):
        x = x_ref[...].astype(jnp.float32)             # (C, bc)
        num_classes, bc = x.shape
        tgt = tgt_ref[...]                             # (1, bc) int32

        # Numerically stable softmax pieces; class axis = sublanes (axis 0).
        m = jnp.max(x, axis=0, keepdims=True)          # (1, bc)
        z = x - m                                      # (C, bc), always <= 0 and finite
        e = jnp.exp(z)                                 # (C, bc)
        sumexp = jnp.sum(e, axis=0, keepdims=True)     # (1, bc), >= 1
        lse = jnp.log(sumexp)                          # (1, bc)
        inv_sumexp = 1.0 / sumexp                      # (1, bc)

        # Gather z at the target class via a one-hot select (class iota on sublanes).
        cls_iota = lax.broadcasted_iota(jnp.int32, (num_classes, bc), 0)
        onehot = cls_iota == tgt                       # (C, bc) bool
        z_t = jnp.sum(jnp.where(onehot, z, 0.0), axis=0, keepdims=True)
        logpt = z_t - lse                              # (1, bc)

        if mode == "FL":                               # FocalLoss(gamma)
            pt = jnp.exp(logpt)
            loss_cols = -_focal_weight(1.0 - pt, gamma) * logpt
        elif mode == "LS":                             # LabelSmoothingLoss(alpha)
            sum_logp = (jnp.sum(z, axis=0, keepdims=True)
                        - jnp.float32(num_classes) * lse)
            off = float(alpha) / float(num_classes - 1)
            loss_cols = -((1.0 - float(alpha)) * logpt + off * (sum_logp - logpt))
        else:                                          # "NLL": CrossEntropyLoss
            loss_cols = -logpt                         # (1, bc)

        probs = e * inv_sumexp                         # (C, bc)

        if valid is not None:                          # masked path: tail block only
            loss_cols = jnp.where(valid, loss_cols, 0.0)
            probs = jnp.where(valid, probs, 0.0)

        cls_ref[...] = jnp.sum(loss_cols).reshape(1, 1, 1)
        conf_ref[...] = jnp.sum(probs, axis=1, keepdims=True).reshape(1, num_classes, 1)

    if not needs_mask:
        body(None)
    else:
        i = pl.program_id(0)
        last = pl.num_programs(0) - 1

        @pl.when(i != last)
        def _():
            body(None)

        @pl.when(i == last)
        def _():
            col = lax.broadcasted_iota(jnp.int32, (1, block_cols), 1) + i * block_cols
            body(col < n_cols)


def _pick_block_cols(n, c, target_bytes=2 << 20, max_cols=1 << 16):
    """Batch tile on the 128-lane axis: ~2 MiB of (sublane-padded) logits per block,
    128-aligned, and >= 2 blocks when N > 128 so v7x's two TCs both get work."""
    if n <= 128:
        return n                                       # single full-extent block
    c_pad = _round_up(max(c, 1), 8)
    cols = target_bytes // (c_pad * 4)
    cols = max(128, min(cols, max_cols))
    half = _round_up(-(-n // 2), 128)                  # ceil(N/2), 128-aligned
    cols = min(cols, half)
    return max(128, (cols // 128) * 128)


def classification_and_mdca(logits, targets, *, loss="NLL+MDCA", alpha=0.1,
                            beta=1.0, gamma=1.0, block_cols=None):
    """Pallas port of ClassficationAndMDCA.forward: loss_cls + beta * MDCA.

    logits: (N, C) float (f32 or bf16), targets: (N,) int.  Returns a scalar f32."""
    N, C = logits.shape
    if "NLL" in loss:
        mode = "NLL"
    elif "FL" in loss:
        mode = "FL"
    else:
        mode = "LS"

    if block_cols is None:
        block_cols = _pick_block_cols(N, C)
    num_blocks = pl.cdiv(N, block_cols)
    needs_mask = (N % block_cols) != 0

    # Lane-pack the class axis: batch on lanes, classes on sublanes.
    x_t = jnp.transpose(logits)                        # (C, N)
    tgt_row = targets.reshape(1, N).astype(jnp.int32)  # (1, N), lane-dense int32

    kernel = functools.partial(
        _cls_mdca_kernel, mode=mode, gamma=float(gamma), alpha=float(alpha),
        n_cols=N, block_cols=block_cols, needs_mask=needs_mask)

    # VMEM budget from PADDED footprints: sublane-padded logits tile + padded targets
    # row, double buffered, plus ~8 live full-tile temporaries.  Capped at 32 MiB so it
    # also fits v7x's 64 MiB physical VMEM with compiler-scratch headroom.
    c_pad = _round_up(max(C, 1), 8)
    bytes_per_elem = 4 if logits.dtype == jnp.float32 else 2
    tile_bytes = c_pad * block_cols * bytes_per_elem   # logits DMA tile (padded)
    tgt_bytes = 8 * block_cols * 4                     # (1, bc) int32 pads to 8 sublanes
    work_tile = c_pad * block_cols * 4                 # f32 temporaries inside the kernel
    vmem_limit = int(min(32 << 20,
                         max(16 << 20, 2 * (tile_bytes + tgt_bytes) + 8 * work_tile)))

    cls_p, conf_p = pl.pallas_call(
        kernel,
        out_shape=(
            jax.ShapeDtypeStruct((num_blocks, 1, 1), jnp.float32),   # cls-loss partial sums
            jax.ShapeDtypeStruct((num_blocks, C, 1), jnp.float32),   # per-class prob partial sums
        ),
        grid_spec=pltpu.PrefetchScalarGridSpec(
            num_scalar_prefetch=0,
            grid=(num_blocks,),
            in_specs=[
                pl.BlockSpec((1, block_cols), lambda i: (0, i)),     # targets (lane-dense row)
                pl.BlockSpec((C, block_cols), lambda i: (0, i)),     # logits, transposed (C, N)
            ],
            out_specs=(
                pl.BlockSpec((1, 1, 1), lambda i: (i, 0, 0)),
                pl.BlockSpec((1, C, 1), lambda i: (i, 0, 0)),
            ),
        ),
        compiler_params=pltpu.CompilerParams(
            dimension_semantics=("parallel",),
            vmem_limit_bytes=vmem_limit,
        ),
    )(tgt_row, x_t)

    # Tiny final combine in the wrapper (keeps the grid fully parallel / megacore-friendly).
    n = jnp.float32(N)
    loss_cls = jnp.sum(cls_p) / n
    avg_conf = jnp.sum(conf_p[:, :, 0], axis=0) / n                   # (C,)
    # Target histogram depends only on `targets`: cheap scatter-add outside the kernel.
    avg_count = jnp.zeros((C,), jnp.float32).at[targets.astype(jnp.int32)].add(1.0) / n
    loss_cal = jnp.mean(jnp.abs(avg_conf - avg_count))
    return loss_cls + jnp.float32(beta) * loss_cal


def classification_and_mdca_ref(logits, targets, *, loss="NLL+MDCA", alpha=0.1,
                                beta=1.0, gamma=1.0):
    """Pure-JAX reference mirroring the PyTorch module exactly."""
    N, C = logits.shape
    logp = jax.nn.log_softmax(logits.astype(jnp.float32), axis=1)
    logpt = jnp.take_along_axis(logp, targets.reshape(-1, 1), axis=1)[:, 0]
    if "NLL" in loss:
        loss_cls = jnp.mean(-logpt)
    elif "FL" in loss:
        pt = jnp.exp(logpt)
        loss_cls = jnp.mean(-((1.0 - pt) ** gamma) * logpt)
    else:
        true_dist = jnp.full((N, C), alpha / (C - 1), dtype=jnp.float32)
        true_dist = true_dist.at[jnp.arange(N), targets].set(1.0 - alpha)
        loss_cls = jnp.mean(jnp.sum(-true_dist * logp, axis=1))
    probs = jax.nn.softmax(logits.astype(jnp.float32), axis=1)
    avg_conf = jnp.mean(probs, axis=0)
    avg_count = jnp.mean(
        (targets[:, None] == jnp.arange(C)[None, :]).astype(jnp.float32), axis=0)
    loss_cal = jnp.mean(jnp.abs(avg_conf - avg_count))
    return loss_cls + beta * loss_cal


if __name__ == "__main__":
    key = jax.random.PRNGKey(0)
    k1, k2, k3, k4, k5, k6 = jax.random.split(key, 6)

    # 1) Module defaults: 'NLL+MDCA' (CrossEntropy + MDCA).  Single 128-column block.
    N1, C1 = 128, 10
    logits1 = jax.random.normal(k1, (N1, C1), dtype=jnp.float32)
    targets1 = jax.random.randint(k2, (N1,), 0, C1, dtype=jnp.int32)
    out1 = jax.block_until_ready(
        classification_and_mdca(logits1, targets1, loss="NLL+MDCA",
                                alpha=0.1, beta=1.0, gamma=1.0))
    ref1 = classification_and_mdca_ref(logits1, targets1, loss="NLL+MDCA",
                                       alpha=0.1, beta=1.0, gamma=1.0)
    assert jnp.allclose(out1, ref1, rtol=1e-5, atol=1e-5), (out1, ref1)

    # 2) Focal variant, N=200 -> 2 grid blocks with a masked tail (exercises pl.when path
    #    and the >=2-block megacore-friendly grid), integer gamma (unrolled pow).
    N2, C2 = 200, 16
    logits2 = jax.random.normal(k3, (N2, C2), dtype=jnp.float32)
    targets2 = jax.random.randint(k4, (N2,), 0, C2, dtype=jnp.int32)
    out2 = jax.block_until_ready(
        classification_and_mdca(logits2, targets2, loss="FL+MDCA",
                                alpha=0.1, beta=0.5, gamma=2.0))
    ref2 = classification_and_mdca_ref(logits2, targets2, loss="FL+MDCA",
                                       alpha=0.1, beta=0.5, gamma=2.0)
    assert jnp.allclose(out2, ref2, rtol=1e-5, atol=1e-5), (out2, ref2)

    # 3) Label-smoothing variant, N=100 -> single full-extent (non-128) lane block.
    N3, C3 = 100, 32
    logits3 = jax.random.normal(k5, (N3, C3), dtype=jnp.float32)
    targets3 = jax.random.randint(k6, (N3,), 0, C3, dtype=jnp.int32)
    out3 = jax.block_until_ready(
        classification_and_mdca(logits3, targets3, loss="LS+MDCA",
                                alpha=0.1, beta=1.0, gamma=1.0))
    ref3 = classification_and_mdca_ref(logits3, targets3, loss="LS+MDCA",
                                       alpha=0.1, beta=1.0, gamma=1.0)
    assert jnp.allclose(out3, ref3, rtol=1e-5, atol=1e-5), (out3, ref3)

    print("KERNEL_OK")
</pallas_src>

<mosaic_0001>
module attributes {stable_mosaic.version = 11 : i64} {
  func.func @_cls_mdca_kernel(%arg0: i32, %arg1: memref<1x128xi32, #tpu.memory_space<vmem>>, %arg2: memref<10x128xf32, #tpu.memory_space<vmem>>, %arg3: memref<1x1x1xf32, #tpu.memory_space<vmem>>, %arg4: memref<1x10x1xf32, #tpu.memory_space<vmem>>) attributes {dimension_semantics = [#tpu.dimension_semantics<parallel>], iteration_bounds = array<i64: 1>, scalar_prefetch = 0 : i64, scratch_operands = 0 : i64, tpu.core_type = #tpu.core_type<tc>, window_params = [{transform_indices = @transform_0, window_bounds = array<i64: 1, 128>}, {transform_indices = @transform_1, window_bounds = array<i64: 10, 128>}, {transform_indices = @transform_2, window_bounds = array<i64: 1, 1, 1>}, {transform_indices = @transform_3, window_bounds = array<i64: 1, 10, 1>}]} {
    %c0 = arith.constant 0 : index
    %c0_0 = arith.constant 0 : index
    %0 = vector.load %arg2[%c0, %c0_0] : memref<10x128xf32, #tpu.memory_space<vmem>>, vector<10x128xf32>
    %c0_1 = arith.constant 0 : index
    %c0_2 = arith.constant 0 : index
    %1 = vector.load %arg1[%c0_1, %c0_2] : memref<1x128xi32, #tpu.memory_space<vmem>>, vector<1x128xi32>
    %cst = arith.constant dense<0xFF800000> : vector<128xf32>
    %2 = vector.multi_reduction <maximumf>, %0, %cst [0] : vector<10x128xf32> to vector<128xf32>
    %3 = vector.shape_cast %2 : vector<128xf32> to vector<1x128xf32>
    %4 = vector.broadcast %3 : vector<1x128xf32> to vector<10x128xf32>
    %5 = arith.subf %0, %4 : vector<10x128xf32>
    %6 = math.exp %5 : vector<10x128xf32>
    %cst_3 = arith.constant dense<0.000000e+00> : vector<128xf32>
    %7 = vector.multi_reduction <add>, %6, %cst_3 [0] : vector<10x128xf32> to vector<128xf32>
    %8 = vector.shape_cast %7 : vector<128xf32> to vector<1x128xf32>
    %9 = math.log %8 : vector<1x128xf32>
    %cst_4 = arith.constant 1.000000e+00 : f32
    %10 = vector.broadcast %cst_4 : f32 to vector<1x128xf32>
    %11 = arith.divf %10, %8 : vector<1x128xf32>
    %12 = tpu.iota {dimensions = array<i32: 0>} : vector<10x128xi32>
    %13 = vector.broadcast %1 : vector<1x128xi32> to vector<10x128xi32>
    %14 = arith.cmpi eq, %12, %13 : vector<10x128xi32>
    %cst_5 = arith.constant 0.000000e+00 : f32
    %15 = vector.broadcast %cst_5 : f32 to vector<10x128xf32>
    %16 = arith.select %14, %5, %15 : vector<10x128xi1>, vector<10x128xf32>
    %cst_6 = arith.constant dense<0.000000e+00> : vector<128xf32>
    %17 = vector.multi_reduction <add>, %16, %cst_6 [0] : vector<10x128xf32> to vector<128xf32>
    %18 = vector.shape_cast %17 : vector<128xf32> to vector<1x128xf32>
    %19 = arith.subf %18, %9 : vector<1x128xf32>
    %cst_7 = arith.constant 0.000000e+00 : f32
    %20 = vector.broadcast %cst_7 : f32 to vector<1x128xf32>
    %21 = arith.subf %20, %19 : vector<1x128xf32>
    %22 = vector.broadcast %11 : vector<1x128xf32> to vector<10x128xf32>
    %23 = arith.mulf %6, %22 : vector<10x128xf32>
    %24 = vector.shape_cast %21 : vector<1x128xf32> to vector<1x1x128xf32>
    %cst_8 = arith.constant dense<0.000000e+00> : vector<1xf32>
    %25 = vector.multi_reduction <add>, %24, %cst_8 [1, 2] : vector<1x1x128xf32> to vector<1xf32>
    %26 = vector.shape_cast %25 : vector<1xf32> to vector<1x1x1xf32>
    %27 = vector.extract %26[0, 0, 0] : f32 from vector<1x1x1xf32>
    %28 = vector.broadcast %27 : f32 to vector<1x1x1xf32>
    %c0_9 = arith.constant 0 : index
    %c0_10 = arith.constant 0 : index
    %c0_11 = arith.constant 0 : index
    %29 = vector.load %arg3[%c0_9, %c0_10, %c0_11] : memref<1x1x1xf32, #tpu.memory_space<vmem>>, vector<1x1x1xf32>
    tpu.vector_store %arg3[%c0_9, %c0_10, %c0_11], %28 {strides = array<i32>} : memref<1x1x1xf32, #tpu.memory_space<vmem>>, vector<1x1x1xf32>,
    %cst_12 = arith.constant dense<0.000000e+00> : vector<10xf32>
    %30 = vector.multi_reduction <add>, %23, %cst_12 [1] : vector<10x128xf32> to vector<10xf32>
    %31 = vector.shape_cast %30 : vector<10xf32> to vector<10x1xf32>
    %32 = vector.shape_cast %31 : vector<10x1xf32> to vector<1x10x1xf32>
    %c0_13 = arith.constant 0 : index
    %c0_14 = arith.constant 0 : index
    %c0_15 = arith.constant 0 : index
    %33 = vector.load %arg4[%c0_13, %c0_14, %c0_15] : memref<1x10x1xf32, #tpu.memory_space<vmem>>, vector<1x10x1xf32>
    tpu.vector_store %arg4[%c0_13, %c0_14, %c0_15], %32 {strides = array<i32>} : memref<1x10x1xf32, #tpu.memory_space<vmem>>, vector<1x10x1xf32>,
    return
  }
  func.func @transform_0(%arg0: i32) -> (i32, i32) {
    %c0_i32 = arith.constant 0 : i32
    %c0_i32_0 = arith.constant 0 : i32
    return %c0_i32, %arg0 : i32, i32
  }
  func.func @transform_1(%arg0: i32) -> (i32, i32) {
    %c0_i32 = arith.constant 0 : i32
    %c0_i32_0 = arith.constant 0 : i32
    return %c0_i32, %arg0 : i32, i32
  }
  func.func @transform_2(%arg0: i32) -> (i32, i32, i32) {
    %c0_i32 = arith.constant 0 : i32
    %c0_i32_0 = arith.constant 0 : i32
    %c0_i32_1 = arith.constant 0 : i32
    return %arg0, %c0_i32, %c0_i32_0 : i32, i32, i32
  }
  func.func @transform_3(%arg0: i32) -> (i32, i32, i32) {
    %c0_i32 = arith.constant 0 : i32
    %c0_i32_0 = arith.constant 0 : i32
    %c0_i32_1 = arith.constant 0 : i32
    return %arg0, %c0_i32, %c0_i32_0 : i32, i32, i32
  }
}

</mosaic_0001>

<bundles_post_ra>
// kernel: tpu_custom_call.1
= control target key start
LH: loop header
LB: loop body
LE: loop exit
PB: predicated region body
PF: predicated region fallthrough
CT: control target
= control target key end

     0   :  { %9 = vsyncpa [#allocation3], 0  ;;  %s290_s0 = inlined_call_operand.hbm [shape: s32[1,128], index: 0, kind: input, shape index: {}]   ;;  %s291_s1 = inlined_call_operand.hbm [shape: f32[10,128], index: 1, kind: input, shape index: {}]   ;;  %s292_s2 = inlined_call_operand.hbm [shape: f32[1,1,1], index: 2, kind: output, shape index: {0}]   ;;  %s293_s3 = inlined_call_operand.vmem [shape: f32[1,10,1], index: 3, kind: output, shape index: {1}]  }
   0x1   :  { %10 = vsyncpa [#allocation6], 0 }
   0x2   :  { %11 = vsyncpa [#allocation4], 0  ;;  %s17_s14 = sshll.u32 %s290_s0, 4  ;;  %s246_s15 = smov [#allocation2]   ;;  %s18_s14 = int_to_ptr.hbm [resolvable:$true] %s17_s14 }
   0x3   :  { %s19_s16 = sshll.u32 %s246_s15, 4  ;;  %s27_s19 = sshll.u32 %s291_s1, 4  ;;  %s20_s16 = int_to_ptr.vmem [resolvable:$true] %s19_s16  ;;  %s28_s19 = int_to_ptr.hbm [resolvable:$true] %s27_s19 }
   0x4   :  { %22 = dma.hbm_to_vmem [thread:$0]  %s18_s14, 16, %s20_s16, [#allocation3]  }
   0x5   :  { %s247_s20 = smov [#allocation5]   ;;  %s248_s22 = smov 128  }
   0x6   :  { %s29_s21 = sshll.u32 %s247_s20, 4  ;;  %s249_s23 = smov 8   ;;  %s30_s21 = int_to_ptr.vmem [resolvable:$true] %s29_s21 }
   0x7   :  { %35 = dma.hbm_to_vmem [thread:$0]  %s28_s19, 256, %s30_s21, [#allocation6], %s248_s22, %s248_s22, %s249_s23  }
   0x8   :  { %240 = dma.done.wait [#allocation3], 16  }
   0x9   :  { %241 = vsyncadd [#allocation3], 4294967280 }
   0xa   :  { %242 = dma.done.wait [#allocation6], 256  }
   0xb   :  { %243 = vsyncadd [#allocation6], 4294967040  ;;  %vm47_vm0 = vcmask 1041408   ;;  %v44_v0 = vld [vmem:[#allocation5] sm:$0xff]  ;;  %v45_v1 = vld [vmem:[#allocation5 + $0x8] sm:$0x3]  ;;  %v87_v4 = vlaneseq }
   0xc   :  { %v48_v2 = vsel %vm47_vm0, %v45_v1, -inf  ;;  %v159_v11 = vld [vmem:[#allocation2] ss:$0 sm:$0xff]  ;;  %vm107_vm3 = vcmask 1040384   ;;  %vm128_vm8 = vcmask 1024   ;;  %vm126_vm9 = vcmask 7168  }
   0xd   :  { %v49_v3 = vmax.f32 %v44_v0, %v48_v2  ;;  %v88_v7 = vshrl.u32 %v87_v4, 7  ;;  %s250_s26 = smov [#allocation7]   ;;  %s137_s30 = sshll.u32 %s292_s2, 4  ;;  %vm119_vm10 = vcmask 0   ;;  %s138_s30 = int_to_ptr.hbm [resolvable:$true] %s137_s30 }
   0xe   :  { %s135_s27 = sshll.u32 %s250_s26, 4  ;;  %s136_s27 = int_to_ptr.vmem [resolvable:$true] %s135_s27 }
   0xf   :  { %v50_v5 = vrot.slane %v49_v3, 4  ;;  %v89_v10 = vadd.s32 8, %v88_v7  ;;  %vm91_vm2 = vcmp.eq.s32.totalorder %v88_v7, %v159_v11 }
  0x11   :  { %v51_v6 = vmax.f32 %v49_v3, %v50_v5  ;;  %vm92_vm1 = vcmp.eq.s32.totalorder %v89_v10, %v159_v11 }
  0x13   :  { %v52_v8 = vrot.slane %v51_v6, 2 }
  0x15   :  { %v53_v9 = vmax.f32 %v51_v6, %v52_v8 }
  0x17   :  { %v54_v12 = vrot.slane %v53_v9, 1 }
  0x19   :  { %v55_v13 = vmax.f32 %v53_v9, %v54_v12 }
  0x1b   :  { %v56_v14 = vsub.f32 %v44_v0, %v55_v13  ;;  %v57_v15 = vsub.f32 %v45_v1, %v55_v13 }
  0x1d   :  { %v58_v16 = vmul.f32 1.442695, %v56_v14  ;;  %v60_v17 = vmul.f32 1.442695, %v57_v15  ;;  %v94_v18 = vsel %vm92_vm1, %v57_v15, 0.0  ;;  %v93_v19 = vsel %vm91_vm2, %v56_v14, 0.0 }
  0x1e   :  { %v95_v20 = vsel %vm47_vm0, %v94_v18, 0.0 }
  0x1f   :  { %160 = vpow2.f32 %v58_v16  ;;  %v96_v21 = vadd.f32 %v95_v20, %v93_v19 }
  0x20   :  { %162 = vpow2.f32 %v60_v17 }
  0x21   :  { %v97_v25 = vrot.slane %v96_v21, 4 }
  0x23   :  { %v98_v28 = vadd.f32 %v97_v25, %v96_v21 }
  0x25   :  { %v161_v22 = vpop.eup %160  ;;  %v99_v31 = vrot.slane %v98_v28, 2 }
  0x26   :  { %v163_v23 = vpop.eup %162 }
  0x27   :  { %v62_v24 = vsel %vm47_vm0, %v163_v23, 0.0  ;;  %v100_v34 = vadd.f32 %v99_v31, %v98_v28 }
  0x28   :  { %v63_v26 = vadd.f32 %v161_v22, %v62_v24 }
  0x29   :  { %v101_v36 = vrot.slane %v100_v34, 1 }
  0x2a   :  { %v64_v27 = vrot.slane %v63_v26, 4 }
  0x2b   :  { %v102_v37 = vadd.f32 %v101_v36, %v100_v34 }
  0x2c   :  { %v65_v29 = vadd.f32 %v64_v27, %v63_v26 }
  0x2e   :  { %v66_v30 = vrot.slane %v65_v29, 2 }
  0x30   :  { %v67_v32 = vadd.f32 %v66_v30, %v65_v29 }
  0x32   :  { %v68_v33 = vrot.slane %v67_v32, 1 }
  0x34   :  { %v69_v35 = vadd.f32 %v68_v33, %v67_v32 }
  0x36   :  { %164 = vlog2.f32 %v69_v35  ;;  %v83_v43 = vand.u32 2147483648, %v69_v35  ;;  %vm77_vm4 = vweird.f32 %v69_v35  ;;  %v81_v45 = vand.u32 2147483647, %v69_v35 }
  0x37   :  { %166 = vrcp.f32 %v69_v35 }
  0x38   :  { %v84_v49 = vor.u32 1.1754944e-38, %v83_v43  ;;  %vm82_vm7 = vcmp.eq.f32.partialorder %v81_v45, 8.507059e+37 }
  0x3c   :  { %v165_v38 = vpop.eup %164 }
  0x3d   :  { %v167_v39 = vpop.eup %166  ;;  %v71_v40 = vmul.f32 0.6931472, %v165_v38 }
  0x3e   :  { %v73_v41 = vmul.f32 %v167_v39, %v69_v35  ;;  %vm78_vm5 = vweird.f32 %v167_v39 }
  0x3f   :  { %v103_v42 = vsub.f32 %v102_v37, %v71_v40  ;;  %vm79_vm6 = vmor %vm77_vm4, %vm78_vm5 }
  0x40   :  { %v74_v44 = vsub.f32 1.0, %v73_v41 }
  0x41   :  { %v104_v46 = vsub.f32 0.0, %v103_v42 }
  0x42   :  { %v75_v47 = vmul.f32 %v167_v39, %v74_v44 }
  0x43   :  { %v108_v48 = vsel %vm107_vm3, %v104_v46, 0.0 }
  0x44   :  { %109 = vadd.xlane.f32.xlu0 %v108_v48  ;;  %v76_v50 = vadd.f32 %v167_v39, %v75_v47 }
  0x46   :  { %v80_v51 = vsel %vm79_vm6, %v167_v39, %v76_v50 }
  0x47   :  { %v85_v52 = vsel %vm82_vm7, %v84_v49, %v80_v51 }
  0x48   :  { %v106_v53 = vmul.f32 %v163_v23, %v85_v52  ;;  %v105_v54 = vmul.f32 %v161_v22, %v85_v52 }
  0x4a   :  { %v123_v55 = vsel %vm47_vm0, %v106_v53, 0.0 }
  0x4b   :  { %124 = vadd.xlane.f32.xlu1 %v123_v55 }
  0x4c   :  { %121 = vadd.xlane.f32.xlu0 %v105_v54 }
  0xb7   :  { %v110_v56 = vpop.xlane.xlu0 %109 }
  0xb8   :  { %v111_v57 = vrot.slane %v110_v56, 4 }
  0xba   :  { %v112_v58 = vadd.f32 %v111_v57, %v110_v56 }
  0xbc   :  { %v113_v59 = vrot.slane %v112_v58, 2 }
  0xbe   :  { %v114_v60 = vadd.f32 %v113_v59, %v112_v58  ;;  %v125_v63 = vpop.xlane.xlu1 %124 }
  0xbf   :  { %v122_v0 = vpop.xlane.xlu0 %121  ;;  %129 = vst.msk [vmem:[%s293_s3 + $0x8] sm:$0x3] %vm128_vm8, %v125_v63 }
  0xc0   :  { %v115_v61 = vrot.slane %v114_v60, 1  ;;  %127 = vst.msk [vmem:[%s293_s3] sm:$0xff] %vm126_vm9, %v122_v0 }
  0xc2   :  { %v116_v62 = vadd.f32 %v115_v61, %v114_v60 }
  0xc4   :  { %152 = vpush %v116_v62 }
  0xf5   :  { %s153_s4 = spop %152 }
  0xf6   :  { %v118_v1 = vstv %s153_s4 }
  0xf7   :  { %120 = vst.msk [vmem:[#allocation7] sm:$0x1] %vm119_vm10, %v118_v1 }
  0xf8   :  { %140 = dma.vmem_to_hbm [thread:$0]  %s136_s27, 16, %s138_s30, [#allocation4]  }
  0xf9   :  { %244 = dma.done.wait [#allocation4], 16  }
  0xfa   :  { %245 = vsyncadd [#allocation4], 4294967280 }
  0xfb   :  { %149 = vsyncpa [#allocation3], 1 }
  0xfc   :  { %150 = vsyncpa [#allocation6], 1 }
  0xfd   :  { %151 = vsyncpa [#allocation4], 1 }

</bundles_post_ra>
